<compile_context>
chip_gen: v5e
topology: v5e:2x2
jax: 0.10.0
libtpu: 0.0.40
codegen_flags: <defaults>
</compile_context>

<pallas_src>
import jax
import jax.numpy as jnp
from jax.experimental import pallas as pl
from jax.experimental.pallas import tpu as pltpu


def _round_up(x, m):
    return ((x + m - 1) // m) * m


def _cdiv(a, b):
    return (a + b - 1) // b


def _cam_kernel(x_ref, w_ref, b_ref, o_ref):
    # x_ref: (1, C, TS)   spatial tile of one image, lane-dense on TS
    # w_ref: (N, C)       1x1 conv weight (resident, single-buffered)
    # b_ref: (N, 1)       bias (broadcasts over lanes)
    # o_ref: (1, N, TS)   logit tile, lane-dense on TS
    acc = jnp.dot(w_ref[...], x_ref[0], preferred_element_type=jnp.float32)
    o_ref[0] = (acc + b_ref[...].astype(jnp.float32)).astype(o_ref.dtype)


def _resident_spec(shape):
    """Constant-index (resident) operand: single-buffer it when supported."""
    try:
        return pl.BlockSpec(shape, lambda b, s: (0, 0),
                            pipeline_mode=pl.Buffered(1))
    except TypeError:  # older jax without pipeline_mode kwarg
        return pl.BlockSpec(shape, lambda b, s: (0, 0))


def cam_classifier_forward(x_nchw, weight, bias, *, tile_s=8192,
                           vmem_budget_bytes=24 * 1024 * 1024):
    """1x1-conv classifier head (NCHW-native Pallas matmul).

    x_nchw : (B, C, H, W) float32 or bfloat16
    weight : (num_classes, C, 1, 1)  -- PyTorch Conv2d weight layout
    bias   : (num_classes,)
    returns: (B, num_classes, H, W), same dtype as x_nchw
    """
    B, C, H, W = x_nchw.shape
    N = weight.shape[0]
    S = H * W

    out_dtype = x_nchw.dtype
    x_bytes = jnp.dtype(x_nchw.dtype).itemsize
    w_bytes = jnp.dtype(weight.dtype).itemsize
    out_bytes = jnp.dtype(out_dtype).itemsize

    # --- VMEM budget: resident weight/bias + double-buffered x and out tiles.
    w_foot = _round_up(N, 8) * _round_up(C, 128) * w_bytes        # resident
    b_foot = _round_up(N, 8) * 128 * w_bytes                      # resident
    resident = w_foot + b_foot
    per_lane = 2 * _round_up(C, 8) * x_bytes + 2 * _round_up(N, 8) * out_bytes
    lanes_budget = max(vmem_budget_bytes - resident, 0) // per_lane
    ts = min(tile_s,
             _round_up(S, 128),
             max(128, (lanes_budget // 128) * 128))
    ts = _round_up(ts, 128)

    # Feed both v7x TensorCores: with B==1 make sure there are >= 2 spatial
    # tiles whenever the spatial extent allows it (free on 1-TC chips).
    if B == 1 and _cdiv(S, ts) < 2 and S > 128:
        ts = max(128, _round_up(_cdiv(S, 2), 128))

    num_s_tiles = _cdiv(S, ts)
    grid = (B, num_s_tiles)

    footprint = resident + per_lane * ts
    vmem_limit = min(max(32 * 1024 * 1024, int(footprint * 1.25) + (2 << 20)),
                     128 * 1024 * 1024)

    # Free views only: no padding, no extra HBM round trips.
    x_flat = x_nchw.reshape(B, C, S)
    w_mat = weight.reshape(N, C)
    b_col = bias.reshape(N, 1)

    cost = pl.CostEstimate(
        flops=2 * B * S * C * N,
        transcendentals=0,
        bytes_accessed=(B * C * S * x_bytes + B * N * S * out_bytes
                        + N * C * w_bytes + N * w_bytes),
    )

    out = pl.pallas_call(
        _cam_kernel,
        out_shape=jax.ShapeDtypeStruct((B, N, S), out_dtype),
        grid_spec=pltpu.PrefetchScalarGridSpec(
            num_scalar_prefetch=0,
            grid=grid,
            in_specs=[
                pl.BlockSpec((1, C, ts), lambda b, s: (b, 0, s)),  # x tile
                _resident_spec((N, C)),                            # weight
                _resident_spec((N, 1)),                            # bias
            ],
            out_specs=pl.BlockSpec((1, N, ts), lambda b, s: (b, 0, s)),
        ),
        compiler_params=pltpu.CompilerParams(
            dimension_semantics=("parallel", "parallel"),
            vmem_limit_bytes=vmem_limit,
        ),
        cost_estimate=cost,
    )(x_flat, w_mat, b_col)

    return out.reshape(B, N, H, W)   # free view back to NCHW logit map


def init_params(key, num_classes, num_feature):
    """Deterministic xavier-uniform init for the 1x1 conv weight, zero bias."""
    fan_in = num_feature          # kernel is 1x1
    fan_out = num_classes
    limit = jnp.sqrt(6.0 / (fan_in + fan_out))
    wkey, _ = jax.random.split(key)
    weight = jax.random.uniform(
        wkey, (num_classes, num_feature, 1, 1),
        minval=-limit, maxval=limit, dtype=jnp.float32)
    bias = jnp.zeros((num_classes,), dtype=jnp.float32)
    return weight, bias


def _reference(x, weight, bias):
    N, C = weight.shape[0], weight.shape[1]
    return (jnp.einsum("bchw,nc->bnhw", x, weight.reshape(N, C))
            + bias.reshape(1, N, 1, 1))


if __name__ == "__main__":
    key = jax.random.PRNGKey(0)
    xkey, pkey, xkey2, xkey3 = jax.random.split(key, 4)

    # Small shapes consistent with the module: B=2, C(num_feature)=32,
    # spatial 16x16, num_classes=8.
    B, C, H, W = 2, 32, 16, 16
    num_classes = 8

    x = jax.random.normal(xkey, (B, C, H, W), dtype=jnp.float32)
    weight, bias = init_params(pkey, num_classes, C)

    out = jax.block_until_ready(cam_classifier_forward(x, weight, bias))
    ref = _reference(x, weight, bias)
    assert out.shape == (B, num_classes, H, W)
    assert jnp.allclose(out, ref, atol=1e-5, rtol=1e-5)

    # Partial-last-block path: S = 63 is not a multiple of 128 (no padding,
    # masked output stores on the last spatial tile) and B == 1.
    x2 = jax.random.normal(xkey2, (1, C, 7, 9), dtype=jnp.float32)
    out2 = jax.block_until_ready(cam_classifier_forward(x2, weight, bias))
    ref2 = _reference(x2, weight, bias)
    assert out2.shape == (1, num_classes, 7, 9)
    assert jnp.allclose(out2, ref2, atol=1e-5, rtol=1e-5)

    # bf16 activations/weights end-to-end (f32 MXU accumulation inside).
    x3 = jax.random.normal(xkey3, (B, C, H, W),
                           dtype=jnp.float32).astype(jnp.bfloat16)
    w_bf16 = weight.astype(jnp.bfloat16)
    b_bf16 = bias.astype(jnp.bfloat16)
    out3 = jax.block_until_ready(cam_classifier_forward(x3, w_bf16, b_bf16))
    ref3 = _reference(x3.astype(jnp.float32), w_bf16.astype(jnp.float32),
                      b_bf16.astype(jnp.float32))
    assert out3.shape == (B, num_classes, H, W)
    assert out3.dtype == jnp.bfloat16
    assert jnp.allclose(out3.astype(jnp.float32), ref3, atol=1e-1, rtol=1e-1)

    print("KERNEL_OK")
</pallas_src>

<mosaic_0001>
module attributes {stable_mosaic.version = 11 : i64} {
  func.func @_cam_kernel(%arg0: i32, %arg1: i32, %arg2: memref<1x32x256xf32, #tpu.memory_space<vmem>>, %arg3: memref<8x32xf32, #tpu.memory_space<vmem>>, %arg4: memref<8x1xf32, #tpu.memory_space<vmem>>, %arg5: memref<1x8x256xf32, #tpu.memory_space<vmem>>) attributes {dimension_semantics = [#tpu.dimension_semantics<parallel>, #tpu.dimension_semantics<parallel>], iteration_bounds = array<i64: 2, 1>, scalar_prefetch = 0 : i64, scratch_operands = 0 : i64, tpu.core_type = #tpu.core_type<tc>, window_params = [{transform_indices = @transform_0, window_bounds = array<i64: 1, 32, 256>}, {pipeline_mode = #tpu.pipeline_mode<synchronous>, transform_indices = @transform_1, window_bounds = array<i64: 8, 32>}, {pipeline_mode = #tpu.pipeline_mode<synchronous>, transform_indices = @transform_2, window_bounds = array<i64: 8, 1>}, {transform_indices = @transform_3, window_bounds = array<i64: 1, 8, 256>}]} {
    %c0 = arith.constant 0 : index
    %c0_0 = arith.constant 0 : index
    %0 = vector.load %arg3[%c0, %c0_0] : memref<8x32xf32, #tpu.memory_space<vmem>>, vector<8x32xf32>
    %c0_1 = arith.constant 0 : index
    %c0_2 = arith.constant 0 : index
    %c0_3 = arith.constant 0 : index
    %1 = vector.load %arg2[%c0_1, %c0_2, %c0_3] : memref<1x32x256xf32, #tpu.memory_space<vmem>>, vector<1x32x256xf32>
    %2 = vector.shape_cast %1 : vector<1x32x256xf32> to vector<32x256xf32>
    %cst = arith.constant dense<0.000000e+00> : vector<8x256xf32>
    %3 = tpu.matmul %0, %2, %cst {dimension_numbers = #tpu.dot_dimension_numbers<[1], [0], [0], [1], [0, 0, 1, 1], [], []>} : vector<8x32xf32>, vector<32x256xf32>, vector<8x256xf32> -> vector<8x256xf32>
    %c0_4 = arith.constant 0 : index
    %c0_5 = arith.constant 0 : index
    %4 = vector.load %arg4[%c0_4, %c0_5] : memref<8x1xf32, #tpu.memory_space<vmem>>, vector<8x1xf32>
    %5 = vector.broadcast %4 : vector<8x1xf32> to vector<8x256xf32>
    %6 = arith.addf %3, %5 : vector<8x256xf32>
    %c0_6 = arith.constant 0 : index
    %c0_7 = arith.constant 0 : index
    %c0_8 = arith.constant 0 : index
    %7 = vector.load %arg5[%c0_6, %c0_7, %c0_8] : memref<1x8x256xf32, #tpu.memory_space<vmem>>, vector<1x8x256xf32>
    %8 = vector.shape_cast %7 : vector<1x8x256xf32> to vector<8x256xf32>
    %9 = vector.shape_cast %6 : vector<8x256xf32> to vector<1x8x256xf32>
    tpu.vector_store %arg5[%c0_6, %c0_7, %c0_8], %9 {strides = array<i32>} : memref<1x8x256xf32, #tpu.memory_space<vmem>>, vector<1x8x256xf32>,
    return
  }
  func.func @transform_0(%arg0: i32, %arg1: i32) -> (i32, i32, i32) {
    %c0_i32 = arith.constant 0 : i32
    %c0_i32_0 = arith.constant 0 : i32
    return %arg0, %c0_i32, %arg1 : i32, i32, i32
  }
  func.func @transform_1(%arg0: i32, %arg1: i32) -> (i32, i32) {
    %c0_i32 = arith.constant 0 : i32
    %c0_i32_0 = arith.constant 0 : i32
    %c0_i32_1 = arith.constant 0 : i32
    return %c0_i32, %c0_i32_0 : i32, i32
  }
  func.func @transform_2(%arg0: i32, %arg1: i32) -> (i32, i32) {
    %c0_i32 = arith.constant 0 : i32
    %c0_i32_0 = arith.constant 0 : i32
    %c0_i32_1 = arith.constant 0 : i32
    return %c0_i32, %c0_i32_0 : i32, i32
  }
  func.func @transform_3(%arg0: i32, %arg1: i32) -> (i32, i32, i32) {
    %c0_i32 = arith.constant 0 : i32
    %c0_i32_0 = arith.constant 0 : i32
    return %arg0, %c0_i32, %arg1 : i32, i32, i32
  }
}

</mosaic_0001>

<bundles_post_ra>
// kernel: tpu_custom_call.1
= control target key start
LH: loop header
LB: loop body
LE: loop exit
PB: predicated region body
PF: predicated region fallthrough
CT: control target
= control target key end

     0   :  { %8 = vsyncpa [#allocation3], 0  ;;  %s724_s0 = inlined_call_operand.hbm [shape: f32[2,32,256], index: 0, kind: input, shape index: {}]   ;;  %s725_s1 = inlined_call_operand.vmem [shape: f32[8,32], index: 1, kind: input, shape index: {}]   ;;  %s726_s2 = inlined_call_operand.vmem [shape: f32[8,1], index: 2, kind: input, shape index: {}]   ;;  %s727_s3 = inlined_call_operand.hbm [shape: f32[2,8,256], index: 3, kind: output, shape index: {}]  }
   0x1   :  { %10 = vsyncpa [#allocation3 + $0x1], 0 }
   0x2   :  { %11 = vsyncpa [#allocation4], 0 }
   0x3   :  { %13 = vsyncpa [#allocation4 + $0x1], 0  ;;  %s597_s12 = smov 0   ;;  %s599_s13 = smov 0  }
   0x4   :  { %s601_s14 = smov 0   ;;  %s603_s15 = smov 0  }
   0x5   :  { %s605_s16 = smov 0   ;;  %s607_s17 = smov 0  }
   0x6 LB: > { %s375_s18 = sadd.s32 4294967295, %s572_s17   ;;  %s376_s19 = sadd.s32 4294967294, %s572_s17   ;;  %s572_s17 = sphi %s607_s17, %s19_s17   ;;  %s568_s16 = sphi %s605_s16, %s736_s16   ;;  %s564_s15 = sphi %s603_s15, %s735_s15   ;;  %s560_s14 = sphi %s601_s14, %s734_s14   ;;  %s556_s13 = sphi %s599_s13, %s733_s13   ;;  %s552_s12 = sphi %s597_s12, %s732_s12  }
   0x7   : > { %s31_s20 = sadd.s32 1, %s568_s16  ;;  %s40_s21 = sadd.s32 1, %s560_s14 }
   0x8   : > { %p33_p0 = scmp.ge.s32.totalorder %s31_s20, 2  ;;  %p47_p1 = scmp.ne.s32.totalorder %s560_s14, %s556_s13 }
   0x9   : > { %p48_p2 = scmp.eq.s32.totalorder %s572_s17, 0  ;;  %p53_p3 = scmp.ne.s32.totalorder %s556_s13, %s552_s12 }
   0xa   : > { %s738_s20 = smov (%p33_p0, %s31_s20), 0  ;;  %p54_p5 = scmp.eq.s32.totalorder %s375_s18, 0 }
   0xb   : > { %p638_p4 = por %p48_p2, %p47_p1  ;;  %s35_s23 = ssub.s32 %s568_s16, %s738_s20 }
   0xc   : > { %p121_p6 = scmp.eq.s32.totalorder %s375_s18, 1  ;;  %p38_p7 = scmp.eq.s32.totalorder %s35_s23, 0 }
   0xd   : > { %p644_p8 = por %p54_p5, %p53_p3  ;;  %p127_p10 = scmp.eq.s32.totalorder %s376_s19, 1 }
   0xe   : > { %p648_p9 = por %p121_p6, %p47_p1  ;;  %p378_p12 = scmp.ge.s32.totalorder %s572_s17, 2 }
   0xf   : > { %s653_s26 = scalar_select %p38_p7, %s560_s14, %s40_s21  }
  0x10   : > { %p655_p11 = por %p127_p10, %p53_p3  ;;  %p406_p13 = scmp.lt.s32.totalorder %s572_s17, 2 }
  0x11   : > { %s153_s28 = sand.u32 1, %s560_s14   ;;  %s392_s30 = sshll.u32 %s568_s16, 6 }
  0x12   : > { %s379_s29 = sshll.u32 %s153_s28, 6  ;;  %s164_s6 = scalar_lea.hbm %s724_s0, %s392_s30 }
  0x13   : > { %s157_s7 = scalar_lea.vmem [#allocation2], %s379_s29  ;;  %s165_s9 = sshll.u32 %s164_s6, 4  ;;  %s166_s9 = int_to_ptr.hbm [resolvable:$true] %s165_s9 }
  0x14   : > { %s167_s8 = sshll.u32 %s157_s7, 4  ;;  %p399_p0 = pnand %p406_p13, %p638_p4  ;;  %s168_s8 = int_to_ptr.vmem [resolvable:$true] %s167_s8 }
  0x15   : > { %p382_p1 = scmp.ge.s32.totalorder %s572_s17, 1  ;;  %s154_s10 = scalar_lea.sflag [#allocation3], %s153_s28 }
  0x16   : > { %s574_s11 = smov 256   ;;  %s575_s18 = smov 16  }
  0x17   : > { %401 = dma.hbm_to_vmem [thread:$0]  (!%p399_p0), %s166_s9, 1024, %s168_s8, %s154_s10, %s574_s11, %s574_s11, %s575_s18  }
  0x18   : > { %p175_p2 = scmp.lt.s32.totalorder %s572_s17, 3 }
  0x1a   : > { %p176_p3 = pnand %p382_p1, %p175_p2 }
  0x1b   : > { %s671_s19 = sand.u32 (!%p176_p3), 1, %s556_s13  }
  0x1c   : > { %179 = sbr.rel (%p176_p3) target bundleno = 174 (0xae), region = 32  ;;  %s383_s21 = sshll.u32 (!%p176_p3), %s671_s19, 6 }
  0x1d   : > { %s182_s23 = scalar_lea.sflag (!%p176_p3), [#allocation3], %s671_s19  ;;  %s185_s29 = scalar_lea.vmem (!%p176_p3), [#allocation2], %s383_s21 }
  0x21   : > { %543 = dma.done.wait (%p644_p8), %s182_s23, 1024  }
  0x22   : > { %545 = vsyncadd (%p644_p8), %s182_s23, 4294966272  ;;  %v576_v0 = vmov 0   ;;  %v218_v1 = vld [vmem:[%s185_s29 + $0x30] sm:$0xff]  ;;  %v219_v2 = vld [vmem:[%s185_s29 + $0x38] sm:$0xff]  ;;  %vm226_vm0 = vcmask 261120   ;;  %s384_s4 = sshll.u32 %s671_s19, 4 }
  0x23   : > { %459 = vset.pattern.permute.xlu0 %v576_v0  ;;  %v216_v3 = vld [vmem:[%s185_s29 + $0x20] sm:$0xff]  ;;  %242 = vmatpush.msra.mxu0 %v218_v1  ;;  %v217_v4 = vld [vmem:[%s185_s29 + $0x28] sm:$0xff]  ;;  %v214_v5 = vld [vmem:[%s185_s29 + $0x10] sm:$0xff]  ;;  %s393_s5 = sshll.u32 %s564_s15, 4  ;;  %s208_s9 = scalar_lea.vmem [#allocation5], %s384_s4 }
  0x24   : > { %262 = vmatpush.msra.mxu1 %v219_v2  ;;  %v215_v6 = vld [vmem:[%s185_s29 + $0x18] sm:$0xff]  ;;  %v220_v7 = vld [vmem:[%s726_s2] sm:$0xff]  ;;  %v213_v9 = vld [vmem:[%s185_s29 + $0x8] sm:$0xff]  ;;  %s286_s8 = scalar_lea.hbm %s727_s3, %s393_s5  ;;  %s288_s10 = sshll.u32 %s208_s9, 4  ;;  %s289_s10 = int_to_ptr.vmem [resolvable:$true] %s288_s10 }
  0x25   : > { %243 = vmatpush.msra.mxu0 %v216_v3  ;;  %v212_v8 = vld [vmem:[%s185_s29] sm:$0xff]  ;;  %223 = vperm.xlu0 %459, %v220_v7   ;;  %s290_s11 = sshll.u32 %s286_s8, 4  ;;  %s273_s18 = scalar_lea.sflag [#allocation4], %s671_s19  ;;  %s291_s11 = int_to_ptr.hbm [resolvable:$true] %s290_s11 }
  0x26   : > { %263 = vmatpush.msra.mxu1 %v217_v4  ;;  %v211_v10 = vld [vmem:[%s725_s1] sm:$0xff]  ;;  %s504_s21 = sshra.s32 %s291_s11, 4  ;;  %s510_s22 = scalar_lea.hbm %s727_s3, 32  ;;  %s505_s21 = int_to_ptr.hbm [resolvable:$true] %s504_s21 }
  0x27   : > { %244 = vmatpush.msra.mxu0 %v214_v5  ;;  %s506_s15 = scalar_lea.hbm %s505_s21, 16  ;;  %p511_p7 = scmp.lt.s32.totalorder %s505_s21, %s727_s3 }
  0x28   : > { %264 = vmatpush.msra.mxu1 %v215_v6  ;;  %p507_p4 = scmp.ne.s32.totalorder %s505_s21, %s506_s15  ;;  %p512_p8 = scmp.lt.s32.totalorder %s510_s22, %s506_s15 }
  0x29   : > { %245 = vmatpush.msra.mxu0 %v212_v8 }
  0x2a   : > { %265 = vmatpush.msra.mxu1 %v213_v9  ;;  %385 = vmatmul.msk.f32.vlgmr.msra.gmra.mxu0 %vm226_vm0, %v211_v10  ;;  %p508_p5 = pnand %p507_p4, %p648_p9  ;;  %p513_p10 = por %p512_p8, %p511_p7 }
  0x2b   : > { %386 = vmatmul.msk.f32.vlgmr.msra.gmra.mxu1 %vm226_vm0, %v211_v10 }
  0x2c   : > { %p509_p6 = pneg %p508_p5 }
  0x2e   : > { %p514_p13 = pnand %p513_p10, %p509_p6 }
  0x97   : > { %v224_v11 = vpop.permute.xlu0 %223 }
  0xa7   : > { %v247_v12 = vpop.f32.mrf.mxu0 }
  0xa8   : > { %v267_v13 = vpop.f32.mrf.mxu1  ;;  %v248_v14 = vadd.f32 %v247_v12, %v224_v11 }
  0xa9   : > { %v268_v15 = vadd.f32 %v267_v13, %v224_v11 }
  0xaa   : > { %270 = vst [vmem:[%s208_s9] sm:$0xff] %v248_v14 }
  0xab   : > { %271 = vst [vmem:[%s208_s9 + $0x8] sm:$0xff] %v268_v15 }
  0xac   : > { %517 = shalt.err (!%p514_p13)
}
  0xad   : > { %396 = dma.vmem_to_hbm [thread:$0]  (%p648_p9), %s289_s10, 256, %s291_s11, %s273_s18  }
  0xae PF: > { %s302_s19 = sand.u32 1, %s552_s12   ;;  %p403_p0 = pnand %p378_p12, %p655_p11 }
  0xaf   : > { %s303_s30 = scalar_lea.sflag [#allocation4], %s302_s19 }
  0xb0   : > { %p404_p1 = pneg %p403_p0 }
  0xb2   : > { %547 = dma.done.wait (%p404_p1), %s303_s30, 256  }
  0xb3   : > { %549 = vsyncadd (%p404_p1), %s303_s30, 4294967040  ;;  %s19_s17 = sadd.s32 1, %s572_s17   ;;  %s732_s12 = smov %s556_s13 }
  0xb4   : > { %p16_p2 = scmp.ge.s32.totalorder %s19_s17, 4   ;;  %s733_s13 = smov %s560_s14 }
  0xb5   : > { %s734_s14 = smov %s653_s26  ;;  %s735_s15 = smov %s568_s16 }
  0xb6   : > { %s736_s16 = smov %s738_s20  ;;  %18 = sbr.rel (!%p16_p2) target bundleno = 6 (0x6), region = 77 }
  0xbb   :  { %309 = vsyncpa [#allocation3], 1 }
  0xbc   :  { %311 = vsyncpa [#allocation3 + $0x1], 1 }
  0xbd   :  { %312 = vsyncpa [#allocation4], 1 }
  0xbe   :  { %314 = vsyncpa [#allocation4 + $0x1], 1 }

</bundles_post_ra>
